<compile_context>
chip_gen: v5e
topology: v5e:2x2
jax: 0.10.0
libtpu: 0.0.40
codegen_flags: <defaults>
</compile_context>

<pallas_src>
import functools

import numpy as np
import jax
import jax.numpy as jnp
from jax.experimental import pallas as pl
from jax.experimental.pallas import tpu as pltpu

_NEG_PAD = -1e9          # pad logit whose BCE-with-logits positive part is exactly 0


def _sq(x):
    return x * x


def _bce_pos(x):
    # numerically stable BCEWithLogits "positive" part: max(x,0) + log(1 + exp(-|x|)).
    # Plain log(1+t) (no Kahan correction) -- abs error <= ~6e-8/elem, far inside tol,
    # and saves an exact divide per element on the EUP-saturating cls loop.
    return jnp.maximum(x, 0.0) + jnp.log(1.0 + jnp.exp(-jnp.abs(x)))


def detection_loss_kernel(counts_ref, cls_ref, box_ref, gt_ref, gtr_ref, out_ref, *,
                          Bt, M, n_images, alpha1, alpha2, iou_thresh):
    g = pl.program_id(0)

    def per_image(bi, carry):
        img = g * Bt + bi                      # global image index
        cnt = counts_ref[img]                  # number of valid GT boxes (SMEM scalar)

        # Per-block cast to f32 (inputs may arrive bf16).
        cls_blk = cls_ref[bi].astype(jnp.float32)    # (R, 128) lane-dense cls logits
        box_blk = box_ref[bi].astype(jnp.float32)    # (5, N)  x1,y1,w,h,obj
        gt_blk = gt_ref[bi].astype(jnp.float32)      # (M, 5)  x1,y1,x2,y2,cls[:,0]
        gtr_blk = gtr_ref[bi].astype(jnp.float32)    # (4, M)  transposed GT boxes (MXU lhs)

        # ---- predicted boxes xywh -> xyxy, and objectness logits; each (1, N) ----
        px1 = box_blk[0:1, :]
        py1 = box_blk[1:2, :]
        px2 = box_blk[2:3, :] + px1
        py2 = box_blk[3:4, :] + py1
        x_obj = box_blk[4:5, :]

        # ---- ground-truth boxes + cls[:, 0] column, each (M, 1) ----
        gx1 = gt_blk[:, 0:1]
        gy1 = gt_blk[:, 1:2]
        gx2 = gt_blk[:, 2:3]
        gy2 = gt_blk[:, 3:4]
        cls_first = gt_blk[:, 4:5]

        # ---- IoU matrix (M, N) == torchvision.ops.box_iou(gt_boxes, bbox_pred) ----
        iw = jnp.maximum(jnp.minimum(gx2, px2) - jnp.maximum(gx1, px1), 0.0)
        ih = jnp.maximum(jnp.minimum(gy2, py2) - jnp.maximum(gy1, py1), 0.0)
        inter = iw * ih
        g_area = (gx2 - gx1) * (gy2 - gy1)     # (M, 1)
        p_area = (px2 - px1) * (py2 - py1)     # (1, N)

        gt_idx = jax.lax.broadcasted_iota(jnp.int32, (M, 1), 0)
        valid = gt_idx < cnt                   # mask padded GT rows
        union = g_area + p_area - inter
        # guard padded rows + degenerate zero-union pairs (value unchanged otherwise)
        union = jnp.where(valid, jnp.maximum(union, 1e-12), 1.0)
        iou = inter / union                    # exact: feeds the threshold & tie-break
        iou_m = jnp.where(valid, iou, -1e30)

        max_iou = jnp.max(iou_m, axis=0, keepdims=True)                   # (1, N)
        is_max = iou_m == max_iou              # exact-equality tie-break == torch first-max
        gt_idx_f = gt_idx.astype(jnp.float32)
        best_idx = jnp.min(jnp.where(is_max, gt_idx_f, 1e9), axis=0, keepdims=True)
        one_hot = (gt_idx_f == best_idx).astype(jnp.float32)              # (M, N)

        pos_mask = max_iou > iou_thresh                                   # (1, N)
        pos_f = pos_mask.astype(jnp.float32)

        # ---- objectness BCE-with-logits (reduction='sum') ----
        obj_loss = jnp.sum(_bce_pos(x_obj) - x_obj * pos_f)

        # ---- class BCE-with-logits (reduction='sum') ----
        # lane-dense slab; lane-padding value _NEG_PAD contributes exactly 0
        cls_bce = jnp.sum(_bce_pos(cls_blk))                              # (R, 128)
        gt_flag = jnp.max(jnp.where(one_hot * pos_f > 0.0, 1.0, 0.0),
                          axis=1, keepdims=True)                          # (M, 1)
        cls_loss = cls_bce - jnp.sum(gt_flag * cls_first)

        # ---- matched-GT gather on the MXU: (4, M) @ (M, N) -> (4, N) ----
        mg = jnp.dot(gtr_blk, one_hot, preferred_element_type=jnp.float32)
        mgx1 = mg[0:1, :]
        mgy1 = mg[1:2, :]
        mgx2 = mg[2:3, :]
        mgy2 = mg[3:4, :]

        # ---- EIoU loss over positive predictions ----
        eiw = jnp.maximum(jnp.minimum(px2, mgx2) - jnp.maximum(px1, mgx1), 0.0)
        eih = jnp.maximum(jnp.minimum(py2, mgy2) - jnp.maximum(py1, mgy1), 0.0)
        e_inter = eiw * eih
        e_tarea = (mgx2 - mgx1) * (mgy2 - mgy1)
        e_union = jnp.where(pos_mask, p_area + e_tarea - e_inter, 1.0)    # guard non-pos
        e_iou = e_inter * pl.reciprocal(e_union, approx=True)

        center_dist = _sq((px1 + px2) * 0.5 - (mgx1 + mgx2) * 0.5) + \
                      _sq((py1 + py2) * 0.5 - (mgy1 + mgy2) * 0.5)
        p_diag = _sq(px2 - px1) + _sq(py2 - py1)
        t_diag = _sq(mgx2 - mgx1) + _sq(mgy2 - mgy1)
        eiou = (1.0 - e_iou
                + center_dist * pl.reciprocal(p_diag + 1e-7, approx=True)
                + _sq(p_diag - t_diag) * pl.reciprocal(p_diag + t_diag + 1e-7, approx=True))

        pos_cnt = jnp.sum(pos_f)
        eiou_sum = jnp.sum(jnp.where(pos_mask, eiou, 0.0))
        bbox_loss = eiou_sum / jnp.maximum(pos_cnt, 1.0)   # mean over positives; 0 if none

        contrib = cls_loss + alpha1 * obj_loss + alpha2 * bbox_loss
        # scalar mask for (never used at these shapes) batch-pad images
        return carry + jnp.where(img < n_images, contrib, 0.0)

    step_total = jax.lax.fori_loop(0, Bt, per_image, jnp.zeros((), jnp.float32))
    out_ref[...] = step_total * jnp.ones(out_ref.shape, jnp.float32)


def detection_loss(cls_preds, obj_preds, bbox_preds, targets, target_counts,
                   alpha1=1.0, alpha2=5.0, iou_thresh=0.5, images_per_step=8):
    B, N, C = cls_preds.shape
    M = targets.shape[1]
    assert M <= N, "matched GT index must be a valid cls_pred row (M <= N), as in the reference"
    assert targets.shape[-1] >= 4

    # --- lane-dense cls slab: (B, N*C) padded to a multiple of 128 lanes (source dtype) ---
    total = N * C
    R = pl.cdiv(total, 128)
    lane_pad = R * 128 - total
    cls_flat = cls_preds.reshape(B, total)
    if lane_pad:
        cls_flat = jnp.pad(cls_flat, ((0, 0), (0, lane_pad)), constant_values=_NEG_PAD)
    cls_dense = cls_flat.reshape(B, R, 128)

    # --- GT boxes + cls[:, :M, 0] column packed as a 5th column (column layout for IoU) ---
    gt_cols = jnp.concatenate([targets[..., :4], cls_preds[:, :M, 0:1]], axis=-1)  # (B, M, 5)
    # --- pre-transposed GT boxes: MXU LHS for the one-hot gather (tiny) ---
    gt_rows = jnp.transpose(targets[..., :4], (0, 2, 1))                            # (B, 4, M)

    # --- bbox (x1,y1,w,h) and objectness packed into a single (B, 5, N) stream ---
    box_obj = jnp.concatenate(
        [jnp.transpose(bbox_preds, (0, 2, 1)),
         jnp.transpose(obj_preds, (0, 2, 1))], axis=1)                              # (B, 5, N)

    counts = target_counts.astype(jnp.int32)

    # --- Bt: largest divisor of B that is <= images_per_step and keeps >= 2 grid steps
    #     (v7x megacore), so no batch-pad copy is ever materialized. ---
    max_bt = max(1, min(int(images_per_step), B if B < 2 else -(-B // 2)))
    Bt = 1
    for cand in range(max_bt, 0, -1):
        if B % cand == 0:
            Bt = cand
            break
    G = -(-B // Bt)
    Bp = G * Bt
    if Bp > B:  # safety fallback; unreachable with the divisor choice above
        pad = Bp - B
        cls_dense = jnp.pad(cls_dense, ((0, pad), (0, 0), (0, 0)))
        box_obj = jnp.pad(box_obj, ((0, pad), (0, 0), (0, 0)))
        gt_cols = jnp.pad(gt_cols, ((0, pad), (0, 0), (0, 0)))
        gt_rows = jnp.pad(gt_rows, ((0, pad), (0, 0), (0, 0)))
        counts = jnp.pad(counts, (0, pad))

    def _isz(a):
        return jnp.dtype(a.dtype).itemsize

    # --- explicit scoped-VMEM budget: double-buffered blocks + headroom, clamped so it
    #     raises v5e's 16 MiB default but stays inside v7x's 64 MiB physical VMEM. ---
    lane_n = -(-N // 128) * 128
    lane_m = max(128, -(-M // 128) * 128)
    blk_bytes = Bt * (R * 128 * _isz(cls_dense)
                      + 8 * lane_n * _isz(box_obj)
                      + 8 * 128 * _isz(gt_cols)
                      + 8 * lane_m * _isz(gt_rows))
    vmem_limit = int(min(64 << 20, max(32 << 20, 4 * blk_bytes + (2 << 20))))

    bytes_accessed = int(cls_dense.size * _isz(cls_dense) + box_obj.size * _isz(box_obj)
                         + gt_cols.size * _isz(gt_cols) + gt_rows.size * _isz(gt_rows)
                         + counts.size * 4 + G * 128 * 4)
    cost = pl.CostEstimate(
        flops=int(B * (48 * M * N + 8 * M * N + 10 * R * 128 + 80 * N)),
        transcendentals=int(B * (2 * R * 128 + 6 * N)),
        bytes_accessed=bytes_accessed)

    kernel = functools.partial(detection_loss_kernel, Bt=Bt, M=M, n_images=B,
                               alpha1=float(alpha1), alpha2=float(alpha2),
                               iou_thresh=float(iou_thresh))
    per_step = pl.pallas_call(
        kernel,
        out_shape=jax.ShapeDtypeStruct((G, 1, 128), jnp.float32),
        grid_spec=pltpu.PrefetchScalarGridSpec(
            num_scalar_prefetch=1,
            grid=(G,),
            in_specs=[
                pl.BlockSpec((Bt, R, 128), lambda g, cnts: (g, 0, 0)),
                pl.BlockSpec((Bt, 5, N), lambda g, cnts: (g, 0, 0)),
                pl.BlockSpec((Bt, M, 5), lambda g, cnts: (g, 0, 0)),
                pl.BlockSpec((Bt, 4, M), lambda g, cnts: (g, 0, 0)),
            ],
            out_specs=pl.BlockSpec((1, 1, 128), lambda g, cnts: (g, 0, 0)),
        ),
        compiler_params=pltpu.CompilerParams(
            dimension_semantics=("parallel",),
            vmem_limit_bytes=vmem_limit),
        cost_estimate=cost,
    )(counts, cls_dense, box_obj, gt_cols, gt_rows)

    return jnp.sum(per_step[:, 0, 0]) / B


# ---------------- pure-numpy reference (mirrors the PyTorch forward) ----------------
def _ref_eiou(pb, tb):
    px1, py1, px2, py2 = pb[:, 0], pb[:, 1], pb[:, 2], pb[:, 3]
    tx1, ty1, tx2, ty2 = tb[:, 0], tb[:, 1], tb[:, 2], tb[:, 3]
    iw = np.clip(np.minimum(px2, tx2) - np.maximum(px1, tx1), 0, None)
    ih = np.clip(np.minimum(py2, ty2) - np.maximum(py1, ty1), 0, None)
    inter = iw * ih
    pa = (px2 - px1) * (py2 - py1)
    ta = (tx2 - tx1) * (ty2 - ty1)
    iou = inter / (pa + ta - inter)
    cd = ((px1 + px2) / 2 - (tx1 + tx2) / 2) ** 2 + ((py1 + py2) / 2 - (ty1 + ty2) / 2) ** 2
    pd = (px2 - px1) ** 2 + (py2 - py1) ** 2
    td = (tx2 - tx1) ** 2 + (ty2 - ty1) ** 2
    return (1 - iou + cd / (pd + 1e-7) + (pd - td) ** 2 / (pd + td + 1e-7)).mean()


def _ref_loss(cls_preds, obj_preds, bbox_preds, targets, counts,
              alpha1=1.0, alpha2=5.0, iou_thresh=0.5):
    cls_preds = np.asarray(cls_preds, np.float64)
    obj_preds = np.asarray(obj_preds, np.float64)
    bbox_preds = np.asarray(bbox_preds, np.float64)
    targets = np.asarray(targets, np.float64)
    counts = np.asarray(counts)
    B = cls_preds.shape[0]

    def bce_sum(x, t):
        return np.sum(np.maximum(x, 0) - x * t + np.log1p(np.exp(-np.abs(x))))

    total = 0.0
    for i in range(B):
        cls_p, obj_p = cls_preds[i], obj_preds[i]
        bb = bbox_preds[i].copy()
        bb[:, 2:] += bb[:, :2]
        cnt = int(counts[i])
        if cnt == 0:
            cls_t = np.zeros_like(cls_p)
            obj_t = np.zeros_like(obj_p)
            bbox_loss = 0.0
        else:
            gt = targets[i][:cnt, :4]
            ix1 = np.maximum(gt[:, None, 0], bb[None, :, 0])
            iy1 = np.maximum(gt[:, None, 1], bb[None, :, 1])
            ix2 = np.minimum(gt[:, None, 2], bb[None, :, 2])
            iy2 = np.minimum(gt[:, None, 3], bb[None, :, 3])
            inter = np.clip(ix2 - ix1, 0, None) * np.clip(iy2 - iy1, 0, None)
            a_g = (gt[:, 2] - gt[:, 0]) * (gt[:, 3] - gt[:, 1])
            a_p = (bb[:, 2] - bb[:, 0]) * (bb[:, 3] - bb[:, 1])
            iou = inter / (a_g[:, None] + a_p[None, :] - inter)
            max_iou = iou.max(axis=0)
            max_idx = iou.argmax(axis=0)
            pos = max_iou > iou_thresh
            obj_t = pos.astype(np.float64)[:, None]
            cls_t = np.zeros_like(cls_p)
            cls_t[max_idx[pos], 0] = 1.0
            bbox_loss = _ref_eiou(bb[pos], gt[max_idx[pos]]) if pos.sum() > 0 else 0.0
        total += bce_sum(cls_p, cls_t) + alpha1 * bce_sum(obj_p, obj_t) + alpha2 * bbox_loss
    return total / B


if __name__ == "__main__":
    B, N, C, M = 2, 128, 4, 8
    key = jax.random.PRNGKey(0)
    k1, k2, k3, k4, k5, k6 = jax.random.split(key, 6)

    cls_preds = jax.random.normal(k1, (B, N, C), jnp.float32)
    obj_preds = jax.random.normal(k2, (B, N, 1), jnp.float32)

    xy = jax.random.uniform(k3, (B, N, 2), jnp.float32, minval=0.0, maxval=10.0)
    wh = jax.random.uniform(k4, (B, N, 2), jnp.float32, minval=2.0, maxval=6.0)
    bbox_preds = jnp.concatenate([xy, wh], axis=-1)            # (x1, y1, w, h)

    gxy = jax.random.uniform(k5, (B, M, 2), jnp.float32, minval=0.0, maxval=10.0)
    gwh = jax.random.uniform(k6, (B, M, 2), jnp.float32, minval=2.0, maxval=6.0)
    targets = jnp.concatenate([gxy, gxy + gwh], axis=-1)       # (x1, y1, x2, y2), padded
    target_counts = jnp.array([5, 0], dtype=jnp.int32)         # image 1 has no GT boxes

    # make a few predictions overlap the GT so the positive / EIoU branch is exercised
    match = jnp.concatenate([gxy[:, :4] + 0.1, gwh[:, :4]], axis=-1)
    bbox_preds = bbox_preds.at[:, :4, :].set(match)

    loss = jax.block_until_ready(
        detection_loss(cls_preds, obj_preds, bbox_preds, targets, target_counts))

    ref = _ref_loss(cls_preds, obj_preds, bbox_preds, targets, target_counts)
    assert np.allclose(float(loss), float(ref), rtol=2e-3, atol=2e-3), (float(loss), float(ref))
    print("KERNEL_OK")
</pallas_src>

<mosaic_0001>
module attributes {stable_mosaic.version = 11 : i64} {
  func.func @detection_loss_kernel(%arg0: i32, %arg1: memref<2xi32, #tpu.memory_space<smem>>, %arg2: memref<1x4x128xf32, #tpu.memory_space<vmem>>, %arg3: memref<1x5x128xf32, #tpu.memory_space<vmem>>, %arg4: memref<1x8x5xf32, #tpu.memory_space<vmem>>, %arg5: memref<1x4x8xf32, #tpu.memory_space<vmem>>, %arg6: memref<1x1x128xf32, #tpu.memory_space<vmem>>) attributes {dimension_semantics = [#tpu.dimension_semantics<parallel>], iteration_bounds = array<i64: 2>, scalar_prefetch = 1 : i64, scratch_operands = 0 : i64, tpu.core_type = #tpu.core_type<tc>, window_params = [{transform_indices = @transform_0, window_bounds = array<i64: 1, 4, 128>}, {transform_indices = @transform_1, window_bounds = array<i64: 1, 5, 128>}, {transform_indices = @transform_2, window_bounds = array<i64: 1, 8, 5>}, {transform_indices = @transform_3, window_bounds = array<i64: 1, 4, 8>}, {transform_indices = @transform_4, window_bounds = array<i64: 1, 1, 128>}]} {
    %cst = arith.constant 0.000000e+00 : f32
    %c0_i32 = arith.constant 0 : i32
    %c1_i32 = arith.constant 1 : i32
    %0 = arith.muli %arg0, %c1_i32 : i32
    %1 = arith.addi %0, %c0_i32 : i32
    %2 = arith.index_cast %1 : i32 to index
    %3 = memref.load %arg1[%2] : memref<2xi32, #tpu.memory_space<smem>>
    %4 = arith.index_cast %c0_i32 : i32 to index
    %c0 = arith.constant 0 : index
    %c0_0 = arith.constant 0 : index
    %5 = vector.load %arg2[%4, %c0, %c0_0] : memref<1x4x128xf32, #tpu.memory_space<vmem>>, vector<1x4x128xf32>
    %6 = vector.shape_cast %5 : vector<1x4x128xf32> to vector<4x128xf32>
    %7 = arith.index_cast %c0_i32 : i32 to index
    %c0_1 = arith.constant 0 : index
    %c0_2 = arith.constant 0 : index
    %8 = vector.load %arg3[%7, %c0_1, %c0_2] : memref<1x5x128xf32, #tpu.memory_space<vmem>>, vector<1x5x128xf32>
    %9 = vector.shape_cast %8 : vector<1x5x128xf32> to vector<5x128xf32>
    %10 = arith.index_cast %c0_i32 : i32 to index
    %c0_3 = arith.constant 0 : index
    %c0_4 = arith.constant 0 : index
    %11 = vector.load %arg4[%10, %c0_3, %c0_4] : memref<1x8x5xf32, #tpu.memory_space<vmem>>, vector<1x8x5xf32>
    %12 = vector.shape_cast %11 : vector<1x8x5xf32> to vector<8x5xf32>
    %13 = arith.index_cast %c0_i32 : i32 to index
    %c0_5 = arith.constant 0 : index
    %c0_6 = arith.constant 0 : index
    %14 = vector.load %arg5[%13, %c0_5, %c0_6] : memref<1x4x8xf32, #tpu.memory_space<vmem>>, vector<1x4x8xf32>
    %15 = vector.shape_cast %14 : vector<1x4x8xf32> to vector<4x8xf32>
    %16 = vector.extract_strided_slice %9 {offsets = [0, 0], sizes = [1, 128], strides = [1, 1]} : vector<5x128xf32> to vector<1x128xf32>
    %17 = vector.extract_strided_slice %9 {offsets = [1, 0], sizes = [1, 128], strides = [1, 1]} : vector<5x128xf32> to vector<1x128xf32>
    %18 = vector.extract_strided_slice %9 {offsets = [2, 0], sizes = [1, 128], strides = [1, 1]} : vector<5x128xf32> to vector<1x128xf32>
    %19 = arith.addf %18, %16 : vector<1x128xf32>
    %20 = vector.extract_strided_slice %9 {offsets = [3, 0], sizes = [1, 128], strides = [1, 1]} : vector<5x128xf32> to vector<1x128xf32>
    %21 = arith.addf %20, %17 : vector<1x128xf32>
    %22 = vector.extract_strided_slice %9 {offsets = [4, 0], sizes = [1, 128], strides = [1, 1]} : vector<5x128xf32> to vector<1x128xf32>
    %23 = vector.extract_strided_slice %12 {offsets = [0, 0], sizes = [8, 1], strides = [1, 1]} : vector<8x5xf32> to vector<8x1xf32>
    %24 = vector.extract_strided_slice %12 {offsets = [0, 1], sizes = [8, 1], strides = [1, 1]} : vector<8x5xf32> to vector<8x1xf32>
    %25 = vector.extract_strided_slice %12 {offsets = [0, 2], sizes = [8, 1], strides = [1, 1]} : vector<8x5xf32> to vector<8x1xf32>
    %26 = vector.extract_strided_slice %12 {offsets = [0, 3], sizes = [8, 1], strides = [1, 1]} : vector<8x5xf32> to vector<8x1xf32>
    %27 = vector.extract_strided_slice %12 {offsets = [0, 4], sizes = [8, 1], strides = [1, 1]} : vector<8x5xf32> to vector<8x1xf32>
    %28 = vector.broadcast %25 : vector<8x1xf32> to vector<8x128xf32>
    %29 = vector.broadcast %19 : vector<1x128xf32> to vector<8x128xf32>
    %30 = arith.minimumf %28, %29 : vector<8x128xf32>
    %31 = vector.broadcast %23 : vector<8x1xf32> to vector<8x128xf32>
    %32 = vector.broadcast %16 : vector<1x128xf32> to vector<8x128xf32>
    %33 = arith.maximumf %31, %32 : vector<8x128xf32>
    %34 = arith.subf %30, %33 : vector<8x128xf32>
    %cst_7 = arith.constant 0.000000e+00 : f32
    %35 = vector.broadcast %cst_7 : f32 to vector<8x128xf32>
    %36 = arith.maximumf %34, %35 : vector<8x128xf32>
    %37 = vector.broadcast %26 : vector<8x1xf32> to vector<8x128xf32>
    %38 = vector.broadcast %21 : vector<1x128xf32> to vector<8x128xf32>
    %39 = arith.minimumf %37, %38 : vector<8x128xf32>
    %40 = vector.broadcast %24 : vector<8x1xf32> to vector<8x128xf32>
    %41 = vector.broadcast %17 : vector<1x128xf32> to vector<8x128xf32>
    %42 = arith.maximumf %40, %41 : vector<8x128xf32>
    %43 = arith.subf %39, %42 : vector<8x128xf32>
    %cst_8 = arith.constant 0.000000e+00 : f32
    %44 = vector.broadcast %cst_8 : f32 to vector<8x128xf32>
    %45 = arith.maximumf %43, %44 : vector<8x128xf32>
    %46 = arith.mulf %36, %45 : vector<8x128xf32>
    %47 = arith.subf %25, %23 : vector<8x1xf32>
    %48 = arith.subf %26, %24 : vector<8x1xf32>
    %49 = arith.mulf %47, %48 : vector<8x1xf32>
    %50 = arith.subf %19, %16 : vector<1x128xf32>
    %51 = arith.subf %21, %17 : vector<1x128xf32>
    %52 = arith.mulf %50, %51 : vector<1x128xf32>
    %53 = tpu.iota {dimensions = array<i32: 0>} : vector<8x1xi32>
    %54 = vector.broadcast %3 : i32 to vector<8x1xi32>
    %55 = arith.cmpi slt, %53, %54 : vector<8x1xi32>
    %56 = vector.broadcast %49 : vector<8x1xf32> to vector<8x128xf32>
    %57 = vector.broadcast %52 : vector<1x128xf32> to vector<8x128xf32>
    %58 = arith.addf %56, %57 : vector<8x128xf32>
    %59 = arith.subf %58, %46 : vector<8x128xf32>
    %cst_9 = arith.constant 9.99999996E-13 : f32
    %60 = vector.broadcast %cst_9 : f32 to vector<8x128xf32>
    %61 = arith.maximumf %59, %60 : vector<8x128xf32>
    %cst_10 = arith.constant 1.000000e+00 : f32
    %62 = vector.shape_cast %55 : vector<8x1xi1> to vector<8x1xi1>
    %63 = vector.broadcast %62 : vector<8x1xi1> to vector<8x128xi1>
    %64 = vector.broadcast %cst_10 : f32 to vector<8x128xf32>
    %65 = arith.select %63, %61, %64 : vector<8x128xi1>, vector<8x128xf32>
    %66 = arith.divf %46, %65 : vector<8x128xf32>
    %cst_11 = arith.constant -1.000000e+30 : f32
    %67 = vector.shape_cast %55 : vector<8x1xi1> to vector<8x1xi1>
    %68 = vector.broadcast %67 : vector<8x1xi1> to vector<8x128xi1>
    %69 = vector.broadcast %cst_11 : f32 to vector<8x128xf32>
    %70 = arith.select %68, %66, %69 : vector<8x128xi1>, vector<8x128xf32>
    %cst_12 = arith.constant dense<0xFF800000> : vector<128xf32>
    %71 = vector.multi_reduction <maximumf>, %70, %cst_12 [0] : vector<8x128xf32> to vector<128xf32>
    %72 = vector.shape_cast %71 : vector<128xf32> to vector<1x128xf32>
    %73 = vector.broadcast %72 : vector<1x128xf32> to vector<8x128xf32>
    %74 = arith.cmpf oeq, %70, %73 : vector<8x128xf32>
    %75 = arith.sitofp %53 : vector<8x1xi32> to vector<8x1xf32>
    %cst_13 = arith.constant 1.000000e+09 : f32
    %76 = vector.shape_cast %75 : vector<8x1xf32> to vector<8x1xf32>
    %77 = vector.broadcast %76 : vector<8x1xf32> to vector<8x128xf32>
    %78 = vector.broadcast %cst_13 : f32 to vector<8x128xf32>
    %79 = arith.select %74, %77, %78 : vector<8x128xi1>, vector<8x128xf32>
    %cst_14 = arith.constant dense<0x7F800000> : vector<128xf32>
    %80 = vector.multi_reduction <minimumf>, %79, %cst_14 [0] : vector<8x128xf32> to vector<128xf32>
    %81 = vector.shape_cast %80 : vector<128xf32> to vector<1x128xf32>
    %82 = vector.broadcast %75 : vector<8x1xf32> to vector<8x128xf32>
    %83 = vector.broadcast %81 : vector<1x128xf32> to vector<8x128xf32>
    %84 = arith.cmpf oeq, %82, %83 : vector<8x128xf32>
    %85 = arith.extui %84 : vector<8x128xi1> to vector<8x128xi32>
    %86 = arith.sitofp %85 : vector<8x128xi32> to vector<8x128xf32>
    %cst_15 = arith.constant 5.000000e-01 : f32
    %87 = vector.broadcast %cst_15 : f32 to vector<1x128xf32>
    %88 = arith.cmpf ogt, %72, %87 : vector<1x128xf32>
    %89 = arith.extui %88 : vector<1x128xi1> to vector<1x128xi32>
    %90 = arith.sitofp %89 : vector<1x128xi32> to vector<1x128xf32>
    %cst_16 = arith.constant 0.000000e+00 : f32
    %91 = vector.broadcast %cst_16 : f32 to vector<1x128xf32>
    %92 = arith.maximumf %22, %91 : vector<1x128xf32>
    %93 = math.absf %22 : vector<1x128xf32>
    %cst_17 = arith.constant 0.000000e+00 : f32
    %94 = vector.broadcast %cst_17 : f32 to vector<1x128xf32>
    %95 = arith.subf %94, %93 : vector<1x128xf32>
    %96 = math.exp %95 : vector<1x128xf32>
    %cst_18 = arith.constant 1.000000e+00 : f32
    %97 = vector.broadcast %cst_18 : f32 to vector<1x128xf32>
    %98 = arith.addf %97, %96 : vector<1x128xf32>
    %99 = math.log %98 : vector<1x128xf32>
    %100 = arith.addf %92, %99 : vector<1x128xf32>
    %101 = arith.mulf %22, %90 : vector<1x128xf32>
    %102 = arith.subf %100, %101 : vector<1x128xf32>
    %103 = vector.shape_cast %102 : vector<1x128xf32> to vector<1x1x128xf32>
    %cst_19 = arith.constant dense<0.000000e+00> : vector<1xf32>
    %104 = vector.multi_reduction <add>, %103, %cst_19 [1, 2] : vector<1x1x128xf32> to vector<1xf32>
    %105 = vector.shape_cast %104 : vector<1xf32> to vector<1x1x1xf32>
    %106 = vector.extract %105[0, 0, 0] : f32 from vector<1x1x1xf32>
    %cst_20 = arith.constant 0.000000e+00 : f32
    %107 = vector.broadcast %cst_20 : f32 to vector<4x128xf32>
    %108 = arith.maximumf %6, %107 : vector<4x128xf32>
    %109 = math.absf %6 : vector<4x128xf32>
    %cst_21 = arith.constant 0.000000e+00 : f32
    %110 = vector.broadcast %cst_21 : f32 to vector<4x128xf32>
    %111 = arith.subf %110, %109 : vector<4x128xf32>
    %112 = math.exp %111 : vector<4x128xf32>
    %cst_22 = arith.constant 1.000000e+00 : f32
    %113 = vector.broadcast %cst_22 : f32 to vector<4x128xf32>
    %114 = arith.addf %113, %112 : vector<4x128xf32>
    %115 = math.log %114 : vector<4x128xf32>
    %116 = arith.addf %108, %115 : vector<4x128xf32>
    %117 = vector.shape_cast %116 : vector<4x128xf32> to vector<1x4x128xf32>
    %cst_23 = arith.constant dense<0.000000e+00> : vector<1xf32>
    %118 = vector.multi_reduction <add>, %117, %cst_23 [1, 2] : vector<1x4x128xf32> to vector<1xf32>
    %119 = vector.shape_cast %118 : vector<1xf32> to vector<1x1x1xf32>
    %120 = vector.extract %119[0, 0, 0] : f32 from vector<1x1x1xf32>
    %121 = vector.broadcast %90 : vector<1x128xf32> to vector<8x128xf32>
    %122 = arith.mulf %86, %121 : vector<8x128xf32>
    %cst_24 = arith.constant 0.000000e+00 : f32
    %123 = vector.broadcast %cst_24 : f32 to vector<8x128xf32>
    %124 = arith.cmpf ogt, %122, %123 : vector<8x128xf32>
    %cst_25 = arith.constant 1.000000e+00 : f32
    %cst_26 = arith.constant 0.000000e+00 : f32
    %125 = vector.broadcast %cst_25 : f32 to vector<8x128xf32>
    %126 = vector.broadcast %cst_26 : f32 to vector<8x128xf32>
    %127 = arith.select %124, %125, %126 : vector<8x128xi1>, vector<8x128xf32>
    %cst_27 = arith.constant dense<0xFF800000> : vector<8xf32>
    %128 = vector.multi_reduction <maximumf>, %127, %cst_27 [1] : vector<8x128xf32> to vector<8xf32>
    %129 = vector.shape_cast %128 : vector<8xf32> to vector<8x1xf32>
    %130 = arith.mulf %129, %27 : vector<8x1xf32>
    %131 = vector.shape_cast %130 : vector<8x1xf32> to vector<1x8x1xf32>
    %cst_28 = arith.constant dense<0.000000e+00> : vector<1xf32>
    %132 = vector.multi_reduction <add>, %131, %cst_28 [1, 2] : vector<1x8x1xf32> to vector<1xf32>
    %133 = vector.shape_cast %132 : vector<1xf32> to vector<1x1x1xf32>
    %134 = vector.extract %133[0, 0, 0] : f32 from vector<1x1x1xf32>
    %135 = arith.subf %120, %134 : f32
    %cst_29 = arith.constant dense<0.000000e+00> : vector<4x128xf32>
    %136 = tpu.matmul %15, %86, %cst_29 {dimension_numbers = #tpu.dot_dimension_numbers<[1], [0], [0], [1], [0, 0, 1, 1], [], []>} : vector<4x8xf32>, vector<8x128xf32>, vector<4x128xf32> -> vector<4x128xf32>
    %137 = vector.extract_strided_slice %136 {offsets = [0, 0], sizes = [1, 128], strides = [1, 1]} : vector<4x128xf32> to vector<1x128xf32>
    %138 = vector.extract_strided_slice %136 {offsets = [1, 0], sizes = [1, 128], strides = [1, 1]} : vector<4x128xf32> to vector<1x128xf32>
    %139 = vector.extract_strided_slice %136 {offsets = [2, 0], sizes = [1, 128], strides = [1, 1]} : vector<4x128xf32> to vector<1x128xf32>
    %140 = vector.extract_strided_slice %136 {offsets = [3, 0], sizes = [1, 128], strides = [1, 1]} : vector<4x128xf32> to vector<1x128xf32>
    %141 = arith.minimumf %19, %139 : vector<1x128xf32>
    %142 = arith.maximumf %16, %137 : vector<1x128xf32>
    %143 = arith.subf %141, %142 : vector<1x128xf32>
    %cst_30 = arith.constant 0.000000e+00 : f32
    %144 = vector.broadcast %cst_30 : f32 to vector<1x128xf32>
    %145 = arith.maximumf %143, %144 : vector<1x128xf32>
    %146 = arith.minimumf %21, %140 : vector<1x128xf32>
    %147 = arith.maximumf %17, %138 : vector<1x128xf32>
    %148 = arith.subf %146, %147 : vector<1x128xf32>
    %cst_31 = arith.constant 0.000000e+00 : f32
    %149 = vector.broadcast %cst_31 : f32 to vector<1x128xf32>
    %150 = arith.maximumf %148, %149 : vector<1x128xf32>
    %151 = arith.mulf %145, %150 : vector<1x128xf32>
    %152 = arith.subf %139, %137 : vector<1x128xf32>
    %153 = arith.subf %140, %138 : vector<1x128xf32>
    %154 = arith.mulf %152, %153 : vector<1x128xf32>
    %155 = arith.addf %52, %154 : vector<1x128xf32>
    %156 = arith.subf %155, %151 : vector<1x128xf32>
    %cst_32 = arith.constant 1.000000e+00 : f32
    %157 = vector.broadcast %cst_32 : f32 to vector<1x128xf32>
    %158 = arith.select %88, %156, %157 : vector<1x128xi1>, vector<1x128xf32>
    %159 = tpu.reciprocal %158 {approx = true} : vector<1x128xf32> -> vector<1x128xf32>
    %160 = arith.mulf %151, %159 : vector<1x128xf32>
    %161 = arith.addf %16, %19 : vector<1x128xf32>
    %cst_33 = arith.constant 5.000000e-01 : f32
    %162 = vector.broadcast %cst_33 : f32 to vector<1x128xf32>
    %163 = arith.mulf %161, %162 : vector<1x128xf32>
    %164 = arith.addf %137, %139 : vector<1x128xf32>
    %cst_34 = arith.constant 5.000000e-01 : f32
    %165 = vector.broadcast %cst_34 : f32 to vector<1x128xf32>
    %166 = arith.mulf %164, %165 : vector<1x128xf32>
    %167 = arith.subf %163, %166 : vector<1x128xf32>
    %168 = arith.mulf %167, %167 : vector<1x128xf32>
    %169 = arith.addf %17, %21 : vector<1x128xf32>
    %cst_35 = arith.constant 5.000000e-01 : f32
    %170 = vector.broadcast %cst_35 : f32 to vector<1x128xf32>
    %171 = arith.mulf %169, %170 : vector<1x128xf32>
    %172 = arith.addf %138, %140 : vector<1x128xf32>
    %cst_36 = arith.constant 5.000000e-01 : f32
    %173 = vector.broadcast %cst_36 : f32 to vector<1x128xf32>
    %174 = arith.mulf %172, %173 : vector<1x128xf32>
    %175 = arith.subf %171, %174 : vector<1x128xf32>
    %176 = arith.mulf %175, %175 : vector<1x128xf32>
    %177 = arith.addf %168, %176 : vector<1x128xf32>
    %178 = arith.subf %19, %16 : vector<1x128xf32>
    %179 = arith.mulf %178, %178 : vector<1x128xf32>
    %180 = arith.subf %21, %17 : vector<1x128xf32>
    %181 = arith.mulf %180, %180 : vector<1x128xf32>
    %182 = arith.addf %179, %181 : vector<1x128xf32>
    %183 = arith.subf %139, %137 : vector<1x128xf32>
    %184 = arith.mulf %183, %183 : vector<1x128xf32>
    %185 = arith.subf %140, %138 : vector<1x128xf32>
    %186 = arith.mulf %185, %185 : vector<1x128xf32>
    %187 = arith.addf %184, %186 : vector<1x128xf32>
    %cst_37 = arith.constant 1.000000e+00 : f32
    %188 = vector.broadcast %cst_37 : f32 to vector<1x128xf32>
    %189 = arith.subf %188, %160 : vector<1x128xf32>
    %cst_38 = arith.constant 1.000000e-07 : f32
    %190 = vector.broadcast %cst_38 : f32 to vector<1x128xf32>
    %191 = arith.addf %182, %190 : vector<1x128xf32>
    %192 = tpu.reciprocal %191 {approx = true} : vector<1x128xf32> -> vector<1x128xf32>
    %193 = arith.mulf %177, %192 : vector<1x128xf32>
    %194 = arith.addf %189, %193 : vector<1x128xf32>
    %195 = arith.subf %182, %187 : vector<1x128xf32>
    %196 = arith.mulf %195, %195 : vector<1x128xf32>
    %197 = arith.addf %182, %187 : vector<1x128xf32>
    %cst_39 = arith.constant 1.000000e-07 : f32
    %198 = vector.broadcast %cst_39 : f32 to vector<1x128xf32>
    %199 = arith.addf %197, %198 : vector<1x128xf32>
    %200 = tpu.reciprocal %199 {approx = true} : vector<1x128xf32> -> vector<1x128xf32>
    %201 = arith.mulf %196, %200 : vector<1x128xf32>
    %202 = arith.addf %194, %201 : vector<1x128xf32>
    %203 = vector.shape_cast %90 : vector<1x128xf32> to vector<1x1x128xf32>
    %cst_40 = arith.constant dense<0.000000e+00> : vector<1xf32>
    %204 = vector.multi_reduction <add>, %203, %cst_40 [1, 2] : vector<1x1x128xf32> to vector<1xf32>
    %205 = vector.shape_cast %204 : vector<1xf32> to vector<1x1x1xf32>
    %206 = vector.extract %205[0, 0, 0] : f32 from vector<1x1x1xf32>
    %cst_41 = arith.constant 0.000000e+00 : f32
    %207 = vector.broadcast %cst_41 : f32 to vector<1x128xf32>
    %208 = arith.select %88, %202, %207 : vector<1x128xi1>, vector<1x128xf32>
    %209 = vector.shape_cast %208 : vector<1x128xf32> to vector<1x1x128xf32>
    %cst_42 = arith.constant dense<0.000000e+00> : vector<1xf32>
    %210 = vector.multi_reduction <add>, %209, %cst_42 [1, 2] : vector<1x1x128xf32> to vector<1xf32>
    %211 = vector.shape_cast %210 : vector<1xf32> to vector<1x1x1xf32>
    %212 = vector.extract %211[0, 0, 0] : f32 from vector<1x1x1xf32>
    %cst_43 = arith.constant 1.000000e+00 : f32
    %213 = arith.maximumf %206, %cst_43 : f32
    %214 = arith.divf %212, %213 : f32
    %cst_44 = arith.constant 1.000000e+00 : f32
    %215 = arith.mulf %cst_44, %106 : f32
    %216 = arith.addf %135, %215 : f32
    %cst_45 = arith.constant 5.000000e+00 : f32
    %217 = arith.mulf %cst_45, %214 : f32
    %218 = arith.addf %216, %217 : f32
    %c2_i32 = arith.constant 2 : i32
    %219 = arith.cmpi slt, %1, %c2_i32 : i32
    %cst_46 = arith.constant 0.000000e+00 : f32
    %220 = arith.select %219, %218, %cst_46 : f32
    %221 = arith.addf %cst, %220 : f32
    %c1_i32_47 = arith.constant 1 : i32
    %cst_48 = arith.constant 1.000000e+00 : f32
    %222 = vector.broadcast %cst_48 : f32 to vector<1x1x128xf32>
    %223 = vector.broadcast %221 : f32 to vector<1x1x128xf32>
    %224 = arith.mulf %223, %222 : vector<1x1x128xf32>
    %c0_49 = arith.constant 0 : index
    %c0_50 = arith.constant 0 : index
    %c0_51 = arith.constant 0 : index
    %225 = vector.load %arg6[%c0_49, %c0_50, %c0_51] : memref<1x1x128xf32, #tpu.memory_space<vmem>>, vector<1x1x128xf32>
    tpu.vector_store %arg6[%c0_49, %c0_50, %c0_51], %224 {strides = array<i32>} : memref<1x1x128xf32, #tpu.memory_space<vmem>>, vector<1x1x128xf32>,
    return
  }
  func.func @transform_0(%arg0: i32, %arg1: memref<2xi32, #tpu.memory_space<smem>>) -> (i32, i32, i32) {
    %c0_i32 = arith.constant 0 : i32
    %c0_i32_0 = arith.constant 0 : i32
    %c0_i32_1 = arith.constant 0 : i32
    return %arg0, %c0_i32, %c0_i32_0 : i32, i32, i32
  }
  func.func @transform_1(%arg0: i32, %arg1: memref<2xi32, #tpu.memory_space<smem>>) -> (i32, i32, i32) {
    %c0_i32 = arith.constant 0 : i32
    %c0_i32_0 = arith.constant 0 : i32
    %c0_i32_1 = arith.constant 0 : i32
    return %arg0, %c0_i32, %c0_i32_0 : i32, i32, i32
  }
  func.func @transform_2(%arg0: i32, %arg1: memref<2xi32, #tpu.memory_space<smem>>) -> (i32, i32, i32) {
    %c0_i32 = arith.constant 0 : i32
    %c0_i32_0 = arith.constant 0 : i32
    %c0_i32_1 = arith.constant 0 : i32
    return %arg0, %c0_i32, %c0_i32_0 : i32, i32, i32
  }
  func.func @transform_3(%arg0: i32, %arg1: memref<2xi32, #tpu.memory_space<smem>>) -> (i32, i32, i32) {
    %c0_i32 = arith.constant 0 : i32
    %c0_i32_0 = arith.constant 0 : i32
    %c0_i32_1 = arith.constant 0 : i32
    return %arg0, %c0_i32, %c0_i32_0 : i32, i32, i32
  }
  func.func @transform_4(%arg0: i32, %arg1: memref<2xi32, #tpu.memory_space<smem>>) -> (i32, i32, i32) {
    %c0_i32 = arith.constant 0 : i32
    %c0_i32_0 = arith.constant 0 : i32
    %c0_i32_1 = arith.constant 0 : i32
    return %arg0, %c0_i32, %c0_i32_0 : i32, i32, i32
  }
}

</mosaic_0001>

<bundles_post_ra>
// kernel: tpu_custom_call.1
= control target key start
LH: loop header
LB: loop body
LE: loop exit
PB: predicated region body
PF: predicated region fallthrough
CT: control target
= control target key end

     0   :  { %s847_s21 = smov [#allocation3]   ;;  %s1052_s0 = inlined_call_operand.vmem [shape: s32[2], index: 0, kind: input, shape index: {}]   ;;  %s1053_s1 = inlined_call_operand.vmem [shape: f32[2,4,128], index: 1, kind: input, shape index: {}]   ;;  %s1054_s2 = inlined_call_operand.vmem [shape: f32[2,5,128], index: 2, kind: input, shape index: {}]   ;;  %s1055_s3 = inlined_call_operand.vmem [shape: f32[2,8,5], index: 3, kind: input, shape index: {}]   ;;  %s1056_s4 = inlined_call_operand.vmem [shape: f32[2,4,8], index: 4, kind: input, shape index: {}]   ;;  %s1057_s5 = inlined_call_operand.hbm [shape: f32[2,1,128], index: 5, kind: output, shape index: {}]  }
   0x1   :  { %s11_s20 = sshll.u32 %s1052_s0, 4  ;;  %s12_s20 = int_to_ptr.vmem [resolvable:$true] %s11_s20 }
   0x2   :  { %14 = dma.vmem_to_smem %s12_s20, 16, %s847_s21, [#allocation2] }
   0x3   :  { %825 = dma.done.wait [#allocation2], 16 }
   0x4   :  { %826 = vsyncadd [#allocation2], 4294967280 }
   0x5   :  { %17 = sfence }
   0x6   :  { %18 = vsyncpa [#allocation5], 0 }
   0x7   :  { %20 = vsyncpa [#allocation5 + $0x1], 0  ;;  %s891_s22 = smov 0   ;;  %s893_s23 = smov 0  }
   0x8   :  { %s895_s24 = smov 0   ;;  %s897_s25 = smov 0  }
   0x9 LB: > { %s912_s0 = sadd.s32 4294967295, %s845_s25   ;;  %s670_s26 = sadd.s32 4294967294, %s845_s25   ;;  %s845_s25 = sphi %s897_s25, %s1065_s25   ;;  %s841_s24 = sphi %s895_s24, %s1064_s24   ;;  %s837_s23 = sphi %s893_s23, %s1063_s23   ;;  %s833_s22 = sphi %s891_s22, %s1062_s22  }
   0xa   : > { %s916_s27 = sadd.s32 1, %s845_s25   ;;  %s137_s28 = sadd.s32 1, %s841_s24 }
   0xb   : > { %s134_s29 = ssub.s32 %s845_s25, %s916_s27  ;;  %p147_p0 = scmp.ne.s32.totalorder %s841_s24, %s837_s23 }
   0xc   : > { %p135_p1 = scmp.eq.s32.totalorder %s134_s29, 0  ;;  %p148_p2 = scmp.eq.s32.totalorder %s912_s0, 1 }
   0xd   : > { %p153_p3 = scmp.ne.s32.totalorder %s837_s23, %s833_s22  ;;  %p154_p4 = scmp.eq.s32.totalorder %s670_s26, 1 }
   0xe   : > { %s927_s30 = scalar_select %p135_p1, %s841_s24, %s137_s28  }
   0xf   : > { %p929_p5 = por %p148_p2, %p147_p0  ;;  %p933_p6 = por %p154_p4, %p153_p3 }
  0x10   : > { %p673_p7 = scmp.ge.s32.totalorder %s845_s25, 1  ;;  %p200_p8 = scmp.lt.s32.totalorder %s845_s25, 3 }
  0x12   : > { %p201_p9 = pnand %p673_p7, %p200_p8 }
  0x13   : > { %p236_p10 = scmp.lt.s32.totalorder (!%p201_p9), %s912_s0, 1  ;;  %s848_s13 = smov (!%p201_p9), 2  }
  0x14   : > { %204 = sbr.rel (%p201_p9) target bundleno = 907 (0x38b), region = 36  ;;  %s851_s14 = smov (!%p201_p9), 127  }
  0x15   : > { %s252_s18 = sld [smem:[#allocation3 + %s912_s0]] (!%p201_p9)  ;;  %s857_s15 = smov (!%p201_p9), 1.0  }
  0x16   : > { %s575_s29 = scalar_lea.hbm (!%p201_p9), %s1057_s5, %s912_s0  ;;  %p561_p11 = scmp.lt.s32.totalorder (!%p201_p9), %s912_s0, 2 }
  0x19   : > { %s941_s8 = scalar_select %p236_p10, %s912_s0, 1  ;;  %v849_v1 = vmov 2   ;;  %v850_v2 = vmov 0   ;;  %v852_v5 = vmov 3   ;;  %v853_v6 = vmov 1  }
  0x1a   : > { %746 = vset.pattern.permute.xlu1 %v849_v1  ;;  %750 = vset.pattern.permute.xlu0 %v849_v1  ;;  %v305_v29 = vlaneseq  ;;  %vm425_vm7 = vcmask 64512   ;;  %vm392_vm10 = vcmask 1043456   ;;  %vm372_vm11 = vcmask 1040384   ;;  %s801_s0 = scalar_lea.hbm %s1057_s5, 2 }
  0x1b   : > { %s675_s9 = sshll.u32 %s941_s8, 3  ;;  %748 = vset.pattern.permute.xlu2 %v852_v5  ;;  %v307_v37 = vstv %s252_s18  ;;  %s674_s19 = sshll.u32 %s941_s8, 2  ;;  %vm413_vm12 = vcmask 7168  }
  0x1c   : > { %s247_s12 = scalar_lea.vmem %s1055_s3, %s675_s9  ;;  %s243_s17 = scalar_lea.vmem %s1054_s2, %s675_s9  ;;  %v306_v34 = vshrl.u32 %v305_v29, 7 }
  0x1d   : > { %v947_v0 = vld [vmem:[%s247_s12] sm:$0xff]  ;;  %s251_s26 = scalar_lea.vmem %s1056_s4, %s674_s19  ;;  %s239_s8 = scalar_lea.vmem %s1053_s1, %s674_s19 }
  0x1e   : > { %291 = vrot.lane.b32.xlu0 %v947_v0, %s848_s13  ;;  %263 = vperm.xlu1 %746, %v947_v0   ;;  %v958_v9 = vld [vmem:[%s243_s17] sm:$0x1f]  ;;  %vm977_vm0 = vcmp.lt.s32.totalorder %v306_v34, %v307_v37  ;;  %v344_v59 = vcvt.s32.f32 %v306_v34  ;;  %s856_s9 = smov 124   ;;  %s234_s18 = sand.u32 1, %s837_s23  }
  0x1f   : > { %277 = vperm.xlu2 %748, %v947_v0   ;;  %v258_v11 = vrot.slane %v958_v9, 6  ;;  %v286_v16 = vperm.slane %v958_v9, 1  ;;  %v272_v17 = vperm.slane %v958_v9, 0  ;;  %v256_v5 = vld [vmem:[%s251_s26] sm:$0xf] }
  0x21   : > { %v962_v13 = vadd.f32 %v258_v11, %v958_v9 }
  0x23   : > { %v266_v14 = vperm.slane %v962_v13, 2  ;;  %v280_v15 = vperm.slane %v962_v13, 3  ;;  %v969_v18 = vsub.f32 %v962_v13, %v258_v11 }
  0x25   : > { %v302_v25 = vrot.slane %v969_v18, 1 }
  0x26   : > { %747 = vset.pattern.permute.xlu1 %v850_v2 }
  0x27   : > { %269 = vperm.xlu1 %747, %v947_v0   ;;  %749 = vset.pattern.permute.xlu2 %v853_v6  ;;  %v973_v28 = vmul.f32 %v302_v25, %v969_v18  ;;  %v854_v6 = vmov 0.0  }
  0x28   : > { %283 = vperm.xlu2 %749, %v947_v0  }
  0x29   : > { %v314_v32 = vperm.slane %v973_v28, 2 }
  0x79   : > { %v278_v10 = vpop.permute.xlu2 %277 }
  0x7a   : > { %v281_v22 = vmin.f32 %v278_v10, %v280_v15  ;;  %v253_v15 = vld [vmem:[%s239_s8] sm:$0xf] }
  0x82   : > { %v284_v19 = vpop.permute.xlu2 %283 }
  0x83   : > { %v287_v23 = vmax.f32 %v284_v19, %v286_v16 }
  0x85   : > { %v288_v26 = vsub.f32 %v281_v22, %v287_v23 }
  0x87   : > { %v289_v30 = vmax.f32 %v288_v26, 0.0 }
  0x90   : > { %v292_v3 = vpop.permute.xlu0 %291  ;;  %v264_v12 = vpop.permute.xlu1 %263 }
  0x91   : > { %v294_v4 = vsub.f32 %v947_v0, %v292_v3  ;;  %v267_v21 = vmin.f32 %v264_v12, %v266_v14  ;;  %v359_v14 = vand.u32 2147483647, %v958_v9 }
  0x93   : > { %296 = vrot.lane.b32.xlu0 %v294_v4, %s851_s14  ;;  %v360_v16 = vsub.f32 0.0, %v359_v14 }
  0x99   : > { %v270_v20 = vpop.permute.xlu1 %269 }
  0x9a   : > { %v273_v24 = vmax.f32 %v270_v20, %v272_v17  ;;  %v384_v17 = vand.u32 2147483647, %v253_v15 }
  0x9c   : > { %v274_v27 = vsub.f32 %v267_v21, %v273_v24  ;;  %v361_v21 = vmul.f32 1.442695, %v360_v16  ;;  %v385_v22 = vsub.f32 0.0, %v384_v17 }
  0x9e   : > { %v275_v31 = vmax.f32 %v274_v27, 0.0  ;;  %v386_v23 = vmul.f32 1.442695, %v385_v22 }
  0xa0   : > { %v290_v35 = vmul.f32 %v289_v30, %v275_v31  ;;  %v358_v30 = vmax.f32 %v958_v9, 0.0 }
 0x105   : > { %v297_v7 = vpop.permute.xlu0 %296 }
 0x106   : > { %v299_v8 = vmul.f32 %v297_v7, %v294_v4 }
 0x108   : > { %311 = vperm.xlu0 %750, %v299_v8   ;;  %v855_v8 = vmov 1.0  }
 0x17a   : > { %v312_v33 = vpop.permute.xlu0 %311 }
 0x17b   : > { %v315_v36 = vadd.f32 %v314_v32, %v312_v33  ;;  %v383_v32 = vmax.f32 %v253_v15, 0.0 }
 0x17d   : > { %v316_v38 = vsub.f32 %v315_v36, %v290_v35 }
 0x17f   : > { %v317_v40 = vmax.f32 %v316_v38, 1e-12 }
 0x181   : > { %v320_v41 = vsel %vm977_vm0, %v317_v40, 1.0 }
 0x182   : > { %751 = vrcp.f32 %v320_v41  ;;  %v332_v45 = vand.u32 2147483648, %v320_v41  ;;  %v330_v47 = vand.u32 2147483647, %v320_v41  ;;  %vm326_vm2 = vweird.f32 %v320_v41 }
 0x183   : > { %753 = vpow2.f32 %v361_v21 }
 0x184   : > { %v333_v49 = vor.u32 1.1754944e-38, %v332_v45  ;;  %vm331_vm4 = vcmp.eq.f32.partialorder %v330_v47, 8.507059e+37  ;;  %755 = vpow2.f32 %v386_v23 }
 0x188   : > { %v752_v42 = vpop.eup %751 }
 0x189   : > { %v322_v43 = vmul.f32 %v752_v42, %v320_v41  ;;  %vm327_vm1 = vweird.f32 %v752_v42  ;;  %v754_v24 = vpop.eup %753 }
 0x18a   : > { %vm328_vm3 = vmor %vm326_vm2, %vm327_vm1  ;;  %v363_v25 = vadd.f32 1.0, %v754_v24  ;;  %v756_v26 = vpop.eup %755 }
 0x18b   : > { %v323_v44 = vsub.f32 1.0, %v322_v43  ;;  %v388_v27 = vadd.f32 1.0, %v756_v26 }
 0x18c   : > { %757 = vlog2.f32 %v363_v25 }
 0x18d   : > { %v324_v46 = vmul.f32 %v752_v42, %v323_v44  ;;  %759 = vlog2.f32 %v388_v27 }
 0x18f   : > { %v325_v48 = vadd.f32 %v752_v42, %v324_v46 }
 0x191   : > { %v329_v50 = vsel %vm328_vm3, %v752_v42, %v325_v48  ;;  %v488_v48 = vmul.f32 %v969_v18, %v969_v18 }
 0x192   : > { %v334_v51 = vsel %vm331_vm4, %v333_v49, %v329_v50  ;;  %v758_v29 = vpop.eup %757 }
 0x193   : > { %v335_v52 = vmul.f32 %v334_v51, %v290_v35  ;;  %v365_v31 = vmul.f32 0.6931472, %v758_v29  ;;  %v760_v33 = vpop.eup %759 }
 0x195   : > { %v336_v53 = vsel %vm977_vm0, %v335_v52, -1e+30  ;;  %v366_v34 = vadd.f32 %v365_v31, %v358_v30  ;;  %v474_v52 = vrot.slane %v962_v13, 2 }
 0x196   : > { %v337_v54 = vrot.slane %v336_v53, 4 }
 0x198   : > { %v338_v55 = vmax.f32 %v336_v53, %v337_v54  ;;  %v490_v54 = vrot.slane %v488_v48, 1 }
 0x19a   : > { %v339_v56 = vrot.slane %v338_v55, 2 }
 0x19c   : > { %v340_v57 = vmax.f32 %v338_v55, %v339_v56 }
 0x19e   : > { %v341_v58 = vrot.slane %v340_v57, 1 }
 0x1a0   : > { %v985_v60 = vmax.f32 %v340_v57, %v341_v58  ;;  %v476_v57 = vadd.f32 %v474_v52, %v958_v9 }
 0x1a2   : > { %vm343_vm5 = vcmp.eq.f32.partialorder %v336_v53, %v985_v60  ;;  %vm355_vm6 = vcmp.gt.f32.partialorder %v985_v60, 0.5 }
 0x1a3   : > { %v345_v61 = vsel %vm343_vm5, %v344_v59, 1e+09  ;;  %v679_v10 = vsel %vm355_vm6, 1.0, %v854_v6 }
 0x1a4   : > { %v346_v62 = vrot.slane %v345_v61, 4  ;;  %v367_v35 = vmul.f32 %v679_v10, %v958_v9  ;;  %v516_v49 = vsel %vm372_vm11, %v679_v10, 0.0 }
 0x1a6   : > { %v347_v63 = vmin.f32 %v345_v61, %v346_v62  ;;  %v368_v38 = vsub.f32 %v366_v34, %v367_v35  ;;  %v492_v61 = vadd.f32 %v490_v54, %v488_v48 }
 0x1a8   : > { %v348_v1 = vrot.slane %v347_v63, 2  ;;  %v370_v41 = vrot.slane %v368_v38, 4 }
 0x1aa   : > { %v349_v2 = vmin.f32 %v347_v63, %v348_v1  ;;  %v373_v45 = vsel %vm372_vm11, %v370_v41, 0.0  ;;  %v477_v63 = vmul.f32 0.5, %v476_v57 }
 0x1ac   : > { %v350_v3 = vrot.slane %v349_v2, 1 }
 0x1ae   : > { %v351_v4 = vmin.f32 %v349_v2, %v350_v3  ;;  %v499_v3 = vadd.f32 1e-07, %v492_v61 }
 0x1b0   : > { %vm352_vm8 = vcmp.eq.f32.partialorder %v344_v59, %v351_v4  ;;  %761 = vrcp.f32 %v499_v3 }
 0x1b1   : > { %v678_v7 = vsel %vm352_vm8, 1.0, %v854_v6  ;;  %680 = vmatpush.msk.msra.mxu0 %vm352_vm8, %v855_v8 }
 0x1b2   : > { %681 = vmatmul.msk.f32.vlgmr.msra.gmra.mxu0 %vm425_vm7, %v256_v5  ;;  %v403_v11 = vmul.f32 %v679_v10, %v678_v7 }
 0x1b4   : > { %vm404_vm9 = vcmp.gt.f32.partialorder %v403_v11, 0.0 }
 0x1b5   : > { %v405_v12 = vsel %vm404_vm9, 1.0, %v854_v6 }
 0x1b6   : > { %406 = vmax.xlane.f32.xlu1 %v405_v12  ;;  %v762_v10 = vpop.eup %761 }
 0x229   : > { %v407_v19 = vpop.xlane.xlu1 %406 }
 0x22a   : > { %v408_v20 = vmul.f32 %v407_v19, %v947_v0  ;;  %v390_v0 = vmul.f32 0.6931472, %v760_v33 }
 0x22c   : > { %410 = vrot.lane.b32.xlu2 %v408_v20, %s856_s9  ;;  %v391_v36 = vadd.f32 %v390_v0, %v383_v32  ;;  %s235_s9 = scalar_lea.vmem [#allocation4], %s234_s18 }
 0x22e   : > { %v393_v37 = vsel %vm392_vm10, %v391_v36, 0.0 }
 0x22f   : > { %394 = vadd.xlane.f32.xlu0 %v393_v37  ;;  %v446_v39 = vpop.f32.mrf.mxu0 }
 0x230   : > { %v450_v40 = vmax.f32 %v958_v9, %v446_v39  ;;  %v449_v42 = vmin.f32 %v962_v13, %v446_v39  ;;  %v461_v44 = vrot.slane %v446_v39, 6  ;;  %v478_v53 = vrot.slane %v446_v39, 2 }
 0x232   : > { %v452_v43 = vrot.slane %v450_v40, 6  ;;  %v463_v47 = vsub.f32 %v446_v39, %v461_v44  ;;  %v480_v58 = vadd.f32 %v478_v53, %v446_v39 }
 0x234   : > { %v454_v46 = vsub.f32 %v449_v42, %v452_v43  ;;  %v465_v51 = vrot.slane %v463_v47, 1  ;;  %v493_v59 = vmul.f32 %v463_v47, %v463_v47  ;;  %v481_v18 = vmul.f32 0.5, %v480_v58 }
 0x236   : > { %v455_v50 = vmax.f32 %v454_v46, 0.0  ;;  %v467_v56 = vmul.f32 %v465_v51, %v463_v47  ;;  %v495_v2 = vrot.slane %v493_v59, 1  ;;  %v482_v4 = vsub.f32 %v477_v63, %v481_v18 }
 0x238   : > { %v457_v55 = vrot.slane %v455_v50, 1  ;;  %v468_v62 = vadd.f32 %v467_v56, %v973_v28  ;;  %v497_v13 = vadd.f32 %v495_v2, %v493_v59  ;;  %v483_v6 = vmul.f32 %v482_v4, %v482_v4 }
 0x239   : > { %v502_v28 = vrot.slane %v762_v10, 2 }
 0x23a   : > { %v459_v1 = vmul.f32 %v457_v55, %v455_v50  ;;  %v511_v9 = vadd.f32 %v497_v13, %v492_v61  ;;  %v485_v8 = vrot.slane %v483_v6, 1  ;;  %v509_v17 = vsub.f32 %v492_v61, %v497_v13 }
 0x23c   : > { %v469_v5 = vsub.f32 %v468_v62, %v459_v1  ;;  %v512_v11 = vadd.f32 1e-07, %v511_v9  ;;  %v487_v12 = vadd.f32 %v485_v8, %v483_v6  ;;  %v510_v21 = vmul.f32 %v509_v17, %v509_v17 }
 0x23e   : > { %v470_v7 = vsel %vm355_vm6, %v469_v5, 1.0  ;;  %v504_v16 = vmul.f32 %v502_v28, %v487_v12 }
 0x23f   : > { %763 = vrcp.f32 %v470_v7 }
 0x240   : > { %765 = vrcp.f32 %v512_v11  ;;  %v506_v20 = vrot.slane %v504_v16, 6 }
 0x245   : > { %v764_v14 = vpop.eup %763 }
 0x246   : > { %v472_v15 = vmul.f32 %v764_v14, %v459_v1  ;;  %v766_v22 = vpop.eup %765 }
 0x247   : > { %v514_v24 = vmul.f32 %v766_v22, %v510_v21 }
 0x248   : > { %v498_v19 = vsub.f32 1.0, %v472_v15 }
 0x24a   : > { %v508_v23 = vadd.f32 %v506_v20, %v498_v19 }
 0x24c   : > { %v515_v25 = vadd.f32 %v514_v24, %v508_v23 }
 0x24e   : > { %v526_v29 = vsel %vm355_vm6, %v515_v25, 0.0 }
 0x24f   : > { %v528_v30 = vrot.slane %v526_v29, 2 }
 0x251   : > { %v530_v31 = vsel %vm372_vm11, %v528_v30, 0.0 }
 0x255   : > { %374 = vadd.xlane.f32.xlu2 %v373_v45 }
 0x25d   : > { %517 = vadd.xlane.f32.xlu2 %v516_v49 }
 0x286   : > { %v411_v26 = vpop.permute.xlu2 %410 }
 0x287   : > { %v414_v27 = vsel %vm413_vm12, %v411_v26, 0.0 }
 0x288   : > { %415 = vadd.xlane.f32.xlu1 %v414_v27 }
 0x290   : > { %531 = vadd.xlane.f32.xlu1 %v530_v31 }
 0x2a2   : > { %v395_v34 = vpop.xlane.xlu0 %394 }
 0x2a3   : > { %v396_v37 = vrot.slane %v395_v34, 4 }
 0x2a5   : > { %v397_v40 = vadd.f32 %v396_v37, %v395_v34 }
 0x2a7   : > { %v398_v41 = vrot.slane %v397_v40, 2 }
 0x2a9   : > { %v399_v42 = vadd.f32 %v398_v41, %v397_v40 }
 0x2ab   : > { %v400_v43 = vrot.slane %v399_v42, 1 }
 0x2ad   : > { %v401_v60 = vadd.f32 %v400_v43, %v399_v42 }
 0x2c8   : > { %v375_v32 = vpop.xlane.xlu2 %374 }
 0x2c9   : > { %v376_v33 = vrot.slane %v375_v32, 4 }
 0x2cb   : > { %v377_v0 = vadd.f32 %v376_v33, %v375_v32 }
 0x2cd   : > { %v378_v35 = vrot.slane %v377_v0, 2 }
 0x2cf   : > { %v379_v36 = vadd.f32 %v378_v35, %v377_v0 }
 0x2d0   : > { %v518_v44 = vpop.xlane.xlu2 %517 }
 0x2d1   : > { %v380_v38 = vrot.slane %v379_v36, 1  ;;  %v519_v45 = vrot.slane %v518_v44, 4 }
 0x2d3   : > { %v381_v39 = vadd.f32 %v380_v38, %v379_v36  ;;  %v520_v46 = vadd.f32 %v519_v45, %v518_v44 }
 0x2d5   : > { %684 = vpush %v381_v39  ;;  %v521_v47 = vrot.slane %v520_v46, 2 }
 0x2d6   : > { %686 = vpush %v401_v60 }
 0x2d7   : > { %v522_v51 = vadd.f32 %v521_v47, %v520_v46 }
 0x2d9   : > { %v523_v55 = vrot.slane %v522_v51, 1 }
 0x2db   : > { %v524_v61 = vadd.f32 %v523_v55, %v522_v51 }
 0x2fb   : > { %v416_v48 = vpop.xlane.xlu1 %415 }
 0x2fc   : > { %v417_v49 = vrot.slane %v416_v48, 4 }
 0x2fe   : > { %v418_v50 = vadd.f32 %v417_v49, %v416_v48 }
 0x300   : > { %v419_v52 = vrot.slane %v418_v50, 2 }
 0x302   : > { %v420_v53 = vadd.f32 %v419_v52, %v418_v50 }
 0x303   : > { %v532_v54 = vpop.xlane.xlu1 %531 }
 0x304   : > { %v533_v56 = vrot.slane %v532_v54, 4  ;;  %v421_v57 = vrot.slane %v420_v53, 1 }
 0x306   : > { %v534_v58 = vadd.f32 %v533_v56, %v532_v54  ;;  %v422_v59 = vadd.f32 %v421_v57, %v420_v53  ;;  %s685_s10 = spop %684 }
 0x307   : > { %s687_s11 = spop %686 }
 0x308   : > { %v535_v62 = vrot.slane %v534_v58, 2  ;;  %688 = vpush %v422_v59 }
 0x309   : > { %690 = vpush %v524_v61 }
 0x30a   : > { %v536_v63 = vadd.f32 %v535_v62, %v534_v58 }
 0x30c   : > { %v537_v18 = vrot.slane %v536_v63, 1 }
 0x30e   : > { %v538_v1 = vadd.f32 %v537_v18, %v536_v63 }
 0x310   : > { %692 = vpush %v538_v1 }
 0x339   : > { %s689_s12 = spop %688 }
 0x33a   : > { %s424_s13 = ssub.f32 %s687_s11, %s689_s12  ;;  %s691_s14 = spop %690 }
 0x33b   : > { %s540_s16 = smax.f32 %s857_s15, %s691_s14  ;;  %s579_s12 = sshll.u32 %s575_s29, 4  ;;  %s580_s12 = int_to_ptr.hbm [resolvable:$true] %s579_s12 }
 0x33c   : > { %s1016_s17 = sadd.f32 %s685_s10, %s424_s13  ;;  %v541_v2 = vstv %s540_s16  ;;  %s577_s10 = sshll.u32 %s235_s9, 4  ;;  %s578_s10 = int_to_ptr.vmem [resolvable:$true] %s577_s10 }
 0x33d   : > { %767 = vrcp.f32 %v541_v2  ;;  %v553_v13 = vand.u32 2147483648, %v541_v2  ;;  %v551_v7 = vand.u32 2147483647, %v541_v2  ;;  %vm547_vm14 = vweird.f32 %v541_v2  ;;  %s567_s13 = scalar_lea.sflag [#allocation5], %s234_s18  ;;  %s795_s14 = sshra.s32 %s580_s12, 4  ;;  %s796_s14 = int_to_ptr.hbm [resolvable:$true] %s795_s14 }
 0x33e   : > { %s797_s15 = scalar_lea.hbm %s796_s14, 1  ;;  %p802_p1 = scmp.lt.s32.totalorder %s796_s14, %s1057_s5 }
 0x33f   : > { %v554_v8 = vor.u32 1.1754944e-38, %v553_v13  ;;  %vm552_vm0 = vcmp.eq.f32.partialorder %v551_v7, 8.507059e+37  ;;  %p798_p12 = scmp.ne.s32.totalorder %s796_s14, %s797_s15  ;;  %p803_p2 = scmp.lt.s32.totalorder %s801_s0, %s797_s15 }
 0x341   : > { %s693_s19 = spop %692  ;;  %p799_p13 = pnand %p798_p12, %p929_p5 }
 0x342   : > { %p804_p3 = por %p803_p2, %p802_p1 }
 0x343   : > { %v768_v3 = vpop.eup %767  ;;  %p800_p0 = pneg %p799_p13 }
 0x344   : > { %v543_v4 = vmul.f32 %v768_v3, %v541_v2  ;;  %vm548_vm13 = vweird.f32 %v768_v3 }
 0x345   : > { %vm549_vm15 = vmor %vm547_vm14, %vm548_vm13  ;;  %p805_p4 = pnand %p804_p3, %p800_p0 }
 0x346   : > { %v544_v5 = vsub.f32 1.0, %v543_v4 }
 0x348   : > { %v545_v6 = vmul.f32 %v768_v3, %v544_v5 }
 0x34a   : > { %v546_v9 = vadd.f32 %v768_v3, %v545_v6 }
 0x34c   : > { %v550_v10 = vsel %vm549_vm15, %v768_v3, %v546_v9 }
 0x34d   : > { %v555_v11 = vsel %vm552_vm0, %v554_v8, %v550_v10 }
 0x34e   : > { %694 = vpush %v555_v11 }
 0x37f   : > { %s695_s20 = spop %694 }
 0x380   : > { %s557_s21 = smul.f32 %s695_s20, %s693_s19 }
 0x382   : > { %s559_s8 = smul.f32 5.0, %s557_s21 }
 0x384   : > { %s560_s11 = sadd.f32 %s559_s8, %s1016_s17 }
 0x386   : > { %s1067_s11 = smov (!%p561_p11, %s560_s11), 0.0 }
 0x387   : > { %v564_v12 = vstv %s1067_s11 }
 0x388   : > { %565 = vst [vmem:[%s235_s9] sm:$0x1] %v564_v12 }
 0x389   : > { %808 = shalt.err (!%p805_p4)
}
 0x38a   : > { %696 = dma.vmem_to_hbm [thread:$0]  (%p929_p5), %s578_s10, 16, %s580_s12, %s567_s13  }
 0x38b PF: > { %p702_p7 = scmp.ge.s32.totalorder %s845_s25, 2  ;;  %s591_s18 = sand.u32 1, %s833_s22  }
 0x38c   : > { %s592_s21 = scalar_lea.sflag [#allocation5], %s591_s18 }
 0x38d   : > { %p699_p8 = pnand %p702_p7, %p933_p6 }
 0x38f   : > { %p700_p9 = pneg %p699_p8 }
 0x391   : > { %828 = dma.done.wait (%p700_p9), %s592_s21, 16  }
 0x392   : > { %830 = vsyncadd (%p700_p9), %s592_s21, 4294967280  ;;  %p23_p10 = scmp.ge.s32.totalorder %s916_s27, 4   ;;  %s1062_s22 = smov %s837_s23 }
 0x393   : > { %s1063_s23 = smov %s841_s24  ;;  %s1064_s24 = smov %s927_s30 }
 0x394   : > { %s1065_s25 = smov %s916_s27  ;;  %25 = sbr.rel (!%p23_p10) target bundleno = 9 (0x9), region = 80 }
 0x399   :  { %597 = vsyncpa [#allocation5], 1 }
 0x39a   :  { %599 = vsyncpa [#allocation5 + $0x1], 1 }

</bundles_post_ra>
